<compile_context>
chip_gen: v5e
topology: v5e:2x2
jax: 0.10.0
libtpu: 0.0.40
codegen_flags: <defaults>
</compile_context>

<pallas_src>
import functools

import jax
import jax.numpy as jnp
from jax import lax
from jax.experimental import pallas as pl
from jax.experimental.pallas import tpu as pltpu


def _round_up(n, m):
    return (n + m - 1) // m * m


def _mlp_kernel(x_ref, w_ref, b_ref, o_ref, *, layer_dims, row_offsets):
    """x_ref: (tile_m, in_features). w_ref: packed (sum_rows, 128). b_ref: (sum_rows, 1).
    o_ref: (1, tile_m)."""
    n_layers = len(layer_dims)
    h = x_ref[...]
    for idx in range(n_layers):
        in_l, out_l = layer_dims[idx]
        row = row_offsets[idx]
        w = w_ref[row:row + out_l, 0:in_l]        # static slices: no runtime cost
        b = b_ref[row:row + out_l, 0:1]           # (out_l, 1), broadcasts over lanes
        if idx == 0:
            # Contract the feature (lane) axes of W1 and x: result is (h1, tile_m),
            # i.e. batch on lanes from here on. Equivalent to pl.dot(w, x, trans_b=True).
            z = lax.dot_general(
                w, h,
                dimension_numbers=(((1,), (1,)), ((), ())),
                preferred_element_type=jnp.float32)
        else:
            z = jnp.dot(w, h, preferred_element_type=jnp.float32)
        z = z + b
        if idx < n_layers - 1:
            # ReLU; cast back to the weight dtype so every matmul sees matched operands.
            h = jnp.maximum(z, 0.0).astype(w_ref.dtype)
        else:
            # (1, tile_m): lane-dense final store; sigmoid lowers to the EUP.
            o_ref[...] = jax.nn.sigmoid(z).astype(o_ref.dtype)


def _pack_params(params, compute_dtype):
    """Pack all weights into one (sum_rows, 128) array and all biases into one
    (sum_rows, 1) array. Each layer's rows are padded to a multiple of 8 so the
    in-kernel static slices are sublane-aligned."""
    lane_pad = _round_up(max(w.shape[1] for (w, _) in params), 128)
    w_blocks, b_blocks, row_offsets, layer_dims = [], [], [], []
    row = 0
    for (w, b) in params:
        out_l, in_l = w.shape
        rpad = _round_up(out_l, 8)
        wp = jnp.zeros((rpad, lane_pad), jnp.float32).at[:out_l, :in_l].set(w)
        bp = jnp.zeros((rpad, 1), jnp.float32).at[:out_l, 0].set(b)
        w_blocks.append(wp)
        b_blocks.append(bp)
        row_offsets.append(row)
        layer_dims.append((in_l, out_l))
        row += rpad
    w_packed = jnp.concatenate(w_blocks, axis=0).astype(compute_dtype)
    b_packed = jnp.concatenate(b_blocks, axis=0)          # biases stay f32
    return w_packed, b_packed, tuple(row_offsets), tuple(layer_dims)


def _choose_tiling(B, max_tile_m):
    if B <= 1024:
        # Tiny / latency path: one lane-aligned tile.
        return _round_up(B, 128), 1
    # Large batch: never collapse to a single grid step so the "parallel" axis
    # can shard across both TensorCores on v7x; cap the tile at max_tile_m.
    tile_m = min(max_tile_m, _round_up(pl.cdiv(B, 2), 128))
    return tile_m, pl.cdiv(B, tile_m)


def mlp_forward(x, params, *, max_tile_m=8192, compute_dtype=jnp.float32):
    """x: (B, in_features). params: [(W, b)] with W:(out, in), b:(out,) (PyTorch layout)."""
    B, in_features = x.shape
    assert params[0][0].shape[1] == in_features
    out_features = params[-1][0].shape[0]
    assert out_features == 1

    tile_m, num_tiles = _choose_tiling(B, max_tile_m)
    b_pad = num_tiles * tile_m

    x = x.astype(compute_dtype)
    if b_pad != B:
        x = jnp.pad(x, ((0, b_pad - B), (0, 0)))

    w_packed, b_packed, row_offsets, layer_dims = _pack_params(params, compute_dtype)

    kernel = functools.partial(_mlp_kernel,
                               layer_dims=layer_dims,
                               row_offsets=row_offsets)

    in_specs = [
        pl.BlockSpec((tile_m, in_features), lambda i: (i, 0)),
        # Packed weights / biases: whole-array blocks with a constant index_map
        # -> DMA'd once, resident in VMEM across grid steps.
        pl.BlockSpec(w_packed.shape, lambda i: (0, 0)),
        pl.BlockSpec(b_packed.shape, lambda i: (0, 0)),
    ]

    out = pl.pallas_call(
        kernel,
        out_shape=jax.ShapeDtypeStruct((1, b_pad), jnp.float32),
        grid_spec=pltpu.PrefetchScalarGridSpec(
            num_scalar_prefetch=0,
            grid=(num_tiles,),
            in_specs=in_specs,
            out_specs=pl.BlockSpec((1, tile_m), lambda i: (0, i)),
        ),
        compiler_params=pltpu.CompilerParams(
            dimension_semantics=("parallel",),
            # Large tiles + padded (tile_m, 128)-lane x blocks need more than
            # v5e's 16 MiB default scoped-VMEM limit.
            vmem_limit_bytes=32 * 1024 * 1024,
        ),
    )(x, w_packed, b_packed)

    # (1, b_pad) lane-major -> (B, 1) to match the PyTorch output layout.
    return out[0, :B].reshape(B, out_features)


def init_params(key, dims):
    """PyTorch-style uniform(-1/sqrt(fan_in), 1/sqrt(fan_in)) init.
    Returns [(W, b)] with W shape (out, in) (nn.Linear layout), b shape (out,)."""
    params = []
    for fan_in, fan_out in zip(dims[:-1], dims[1:]):
        key, kw, kb = jax.random.split(key, 3)
        bound = 1.0 / jnp.sqrt(jnp.float32(fan_in))
        w = jax.random.uniform(kw, (fan_out, fan_in), jnp.float32, -bound, bound)
        b = jax.random.uniform(kb, (fan_out,), jnp.float32, -bound, bound)
        params.append((w, b))
    return params


def reference_forward(x, params):
    """Pure-JAX reference of the same forward pass (PyTorch weight layout)."""
    h = x
    for (w, b) in params[:-1]:
        h = jnp.maximum(h @ w.T + b, 0.0)
    w, b = params[-1]
    return jax.nn.sigmoid(h @ w.T + b)


if __name__ == "__main__":
    key = jax.random.PRNGKey(0)
    kx, kx2, kp = jax.random.split(key, 3)

    dims = (16, 32, 24, 12, 6, 1)  # in_features, h1, h2, h3, h4, out_features
    params = init_params(kp, dims)

    # Small demo batch: single grid step, one lane-aligned (128-row) tile.
    B = 16
    x = jax.random.normal(kx, (B, dims[0]), jnp.float32)
    out = jax.block_until_ready(mlp_forward(x, params))
    ref = reference_forward(x, params)
    assert out.shape == (B, 1)
    assert jnp.allclose(out, ref, atol=2e-5, rtol=1e-4), "mismatch vs reference (small batch)"

    # Larger batch: exercises the multi-tile path (>= 2 parallel tiles for v7x dual TC).
    B2 = 4000
    x2 = jax.random.normal(kx2, (B2, dims[0]), jnp.float32)
    out2 = jax.block_until_ready(mlp_forward(x2, params))
    ref2 = reference_forward(x2, params)
    assert out2.shape == (B2, 1)
    assert jnp.allclose(out2, ref2, atol=2e-5, rtol=1e-4), "mismatch vs reference (large batch)"

    # Optional bf16 input/weight path (halves HBM read traffic); f32 accumulation.
    out3 = jax.block_until_ready(
        mlp_forward(x2, params, compute_dtype=jnp.bfloat16))
    assert out3.shape == (B2, 1)
    assert jnp.allclose(out3, ref2, atol=2e-2), "mismatch vs reference (bf16 path)"

    print("KERNEL_OK")
</pallas_src>

<mosaic_0001>
module attributes {stable_mosaic.version = 11 : i64} {
  func.func @_mlp_kernel(%arg0: i32, %arg1: memref<128x16xf32, #tpu.memory_space<vmem>>, %arg2: memref<88x128xf32, #tpu.memory_space<vmem>>, %arg3: memref<88x1xf32, #tpu.memory_space<vmem>>, %arg4: memref<1x128xf32, #tpu.memory_space<vmem>>) attributes {dimension_semantics = [#tpu.dimension_semantics<parallel>], iteration_bounds = array<i64: 1>, scalar_prefetch = 0 : i64, scratch_operands = 0 : i64, tpu.core_type = #tpu.core_type<tc>, window_params = [{transform_indices = @transform_0, window_bounds = array<i64: 128, 16>}, {pipeline_mode = #tpu.pipeline_mode<synchronous>, transform_indices = @transform_1, window_bounds = array<i64: 88, 128>}, {pipeline_mode = #tpu.pipeline_mode<synchronous>, transform_indices = @transform_2, window_bounds = array<i64: 88, 1>}, {transform_indices = @transform_3, window_bounds = array<i64: 1, 128>}]} {
    %c0 = arith.constant 0 : index
    %c0_0 = arith.constant 0 : index
    %0 = vector.load %arg1[%c0, %c0_0] : memref<128x16xf32, #tpu.memory_space<vmem>>, vector<128x16xf32>
    %c0_1 = arith.constant 0 : index
    %c0_2 = arith.constant 0 : index
    %1 = vector.load %arg2[%c0_1, %c0_2] : memref<88x128xf32, #tpu.memory_space<vmem>>, vector<32x16xf32>
    %c0_3 = arith.constant 0 : index
    %c0_4 = arith.constant 0 : index
    %2 = vector.load %arg3[%c0_3, %c0_4] : memref<88x1xf32, #tpu.memory_space<vmem>>, vector<32x1xf32>
    %cst = arith.constant dense<0.000000e+00> : vector<32x128xf32>
    %3 = tpu.matmul %1, %0, %cst {dimension_numbers = #tpu.dot_dimension_numbers<[1], [1], [0], [0], [0, 0, 1, 0], [], []>} : vector<32x16xf32>, vector<128x16xf32>, vector<32x128xf32> -> vector<32x128xf32>
    %4 = vector.broadcast %2 : vector<32x1xf32> to vector<32x128xf32>
    %5 = arith.addf %3, %4 : vector<32x128xf32>
    %cst_5 = arith.constant 0.000000e+00 : f32
    %6 = vector.broadcast %cst_5 : f32 to vector<32x128xf32>
    %7 = arith.maximumf %5, %6 : vector<32x128xf32>
    %c32 = arith.constant 32 : index
    %c0_6 = arith.constant 0 : index
    %8 = vector.load %arg2[%c32, %c0_6] : memref<88x128xf32, #tpu.memory_space<vmem>>, vector<24x32xf32>
    %c32_7 = arith.constant 32 : index
    %c0_8 = arith.constant 0 : index
    %9 = vector.load %arg3[%c32_7, %c0_8] : memref<88x1xf32, #tpu.memory_space<vmem>>, vector<24x1xf32>
    %cst_9 = arith.constant dense<0.000000e+00> : vector<24x128xf32>
    %10 = tpu.matmul %8, %7, %cst_9 {dimension_numbers = #tpu.dot_dimension_numbers<[1], [0], [0], [1], [0, 0, 1, 1], [], []>} : vector<24x32xf32>, vector<32x128xf32>, vector<24x128xf32> -> vector<24x128xf32>
    %11 = vector.broadcast %9 : vector<24x1xf32> to vector<24x128xf32>
    %12 = arith.addf %10, %11 : vector<24x128xf32>
    %cst_10 = arith.constant 0.000000e+00 : f32
    %13 = vector.broadcast %cst_10 : f32 to vector<24x128xf32>
    %14 = arith.maximumf %12, %13 : vector<24x128xf32>
    %c56 = arith.constant 56 : index
    %c0_11 = arith.constant 0 : index
    %15 = vector.load %arg2[%c56, %c0_11] : memref<88x128xf32, #tpu.memory_space<vmem>>, vector<12x24xf32>
    %c56_12 = arith.constant 56 : index
    %c0_13 = arith.constant 0 : index
    %16 = vector.load %arg3[%c56_12, %c0_13] : memref<88x1xf32, #tpu.memory_space<vmem>>, vector<12x1xf32>
    %cst_14 = arith.constant dense<0.000000e+00> : vector<12x128xf32>
    %17 = tpu.matmul %15, %14, %cst_14 {dimension_numbers = #tpu.dot_dimension_numbers<[1], [0], [0], [1], [0, 0, 1, 1], [], []>} : vector<12x24xf32>, vector<24x128xf32>, vector<12x128xf32> -> vector<12x128xf32>
    %18 = vector.broadcast %16 : vector<12x1xf32> to vector<12x128xf32>
    %19 = arith.addf %17, %18 : vector<12x128xf32>
    %cst_15 = arith.constant 0.000000e+00 : f32
    %20 = vector.broadcast %cst_15 : f32 to vector<12x128xf32>
    %21 = arith.maximumf %19, %20 : vector<12x128xf32>
    %c72 = arith.constant 72 : index
    %c0_16 = arith.constant 0 : index
    %22 = vector.load %arg2[%c72, %c0_16] : memref<88x128xf32, #tpu.memory_space<vmem>>, vector<6x12xf32>
    %c72_17 = arith.constant 72 : index
    %c0_18 = arith.constant 0 : index
    %23 = vector.load %arg3[%c72_17, %c0_18] : memref<88x1xf32, #tpu.memory_space<vmem>>, vector<6x1xf32>
    %cst_19 = arith.constant dense<0.000000e+00> : vector<6x128xf32>
    %24 = tpu.matmul %22, %21, %cst_19 {dimension_numbers = #tpu.dot_dimension_numbers<[1], [0], [0], [1], [0, 0, 1, 1], [], []>} : vector<6x12xf32>, vector<12x128xf32>, vector<6x128xf32> -> vector<6x128xf32>
    %25 = vector.broadcast %23 : vector<6x1xf32> to vector<6x128xf32>
    %26 = arith.addf %24, %25 : vector<6x128xf32>
    %cst_20 = arith.constant 0.000000e+00 : f32
    %27 = vector.broadcast %cst_20 : f32 to vector<6x128xf32>
    %28 = arith.maximumf %26, %27 : vector<6x128xf32>
    %c80 = arith.constant 80 : index
    %c0_21 = arith.constant 0 : index
    %29 = vector.load %arg2[%c80, %c0_21] : memref<88x128xf32, #tpu.memory_space<vmem>>, vector<1x6xf32>
    %c80_22 = arith.constant 80 : index
    %c0_23 = arith.constant 0 : index
    %30 = vector.load %arg3[%c80_22, %c0_23] : memref<88x1xf32, #tpu.memory_space<vmem>>, vector<1x1xf32>
    %cst_24 = arith.constant dense<0.000000e+00> : vector<1x128xf32>
    %31 = tpu.matmul %29, %28, %cst_24 {dimension_numbers = #tpu.dot_dimension_numbers<[1], [0], [0], [1], [0, 0, 1, 1], [], []>} : vector<1x6xf32>, vector<6x128xf32>, vector<1x128xf32> -> vector<1x128xf32>
    %32 = vector.broadcast %30 : vector<1x1xf32> to vector<1x128xf32>
    %33 = arith.addf %31, %32 : vector<1x128xf32>
    %34 = arith.negf %33 : vector<1x128xf32>
    %35 = math.exp %34 : vector<1x128xf32>
    %cst_25 = arith.constant 1.000000e+00 : f32
    %36 = vector.broadcast %cst_25 : f32 to vector<1x128xf32>
    %37 = arith.addf %36, %35 : vector<1x128xf32>
    %38 = arith.divf %36, %37 : vector<1x128xf32>
    %c0_26 = arith.constant 0 : index
    %c0_27 = arith.constant 0 : index
    %39 = vector.load %arg4[%c0_26, %c0_27] : memref<1x128xf32, #tpu.memory_space<vmem>>, vector<1x128xf32>
    tpu.vector_store %arg4[%c0_26, %c0_27], %38 {strides = array<i32>} : memref<1x128xf32, #tpu.memory_space<vmem>>, vector<1x128xf32>,
    return
  }
  func.func @transform_0(%arg0: i32) -> (i32, i32) {
    %c0_i32 = arith.constant 0 : i32
    %c0_i32_0 = arith.constant 0 : i32
    return %arg0, %c0_i32 : i32, i32
  }
  func.func @transform_1(%arg0: i32) -> (i32, i32) {
    %c0_i32 = arith.constant 0 : i32
    %c0_i32_0 = arith.constant 0 : i32
    %c0_i32_1 = arith.constant 0 : i32
    return %c0_i32, %c0_i32_0 : i32, i32
  }
  func.func @transform_2(%arg0: i32) -> (i32, i32) {
    %c0_i32 = arith.constant 0 : i32
    %c0_i32_0 = arith.constant 0 : i32
    %c0_i32_1 = arith.constant 0 : i32
    return %c0_i32, %c0_i32_0 : i32, i32
  }
  func.func @transform_3(%arg0: i32) -> (i32, i32) {
    %c0_i32 = arith.constant 0 : i32
    %c0_i32_0 = arith.constant 0 : i32
    return %c0_i32, %arg0 : i32, i32
  }
}

</mosaic_0001>

<bundles_post_ra>
// kernel: tpu_custom_call.1
= control target key start
LH: loop header
LB: loop body
LE: loop exit
PB: predicated region body
PF: predicated region fallthrough
CT: control target
= control target key end

     0   :  { %vm59_vm0 = vcmask 130048   ;;  %s590_s0 = inlined_call_operand.vmem [shape: f32[128,16], index: 0, kind: input, shape index: {}]   ;;  %s591_s1 = inlined_call_operand.vmem [shape: f32[88,128], index: 1, kind: input, shape index: {}]   ;;  %s592_s2 = inlined_call_operand.vmem [shape: f32[88,1], index: 2, kind: input, shape index: {}]   ;;  %s593_s3 = inlined_call_operand.hbm [shape: f32[1,128], index: 3, kind: output, shape index: {}]  }
   0x1   :  { %v30_v0 = vld [vmem:[%s590_s0 + $0x78] sm:$0xff]  ;;  %v29_v1 = vld [vmem:[%s590_s0 + $0x70] sm:$0xff] }
   0x2   :  { %366 = vmatpush.xpose.msk.msra.mxu0 %vm59_vm0, %v30_v0 }
   0x3   :  { %8 = vsyncpa [#allocation3], 0  ;;  %v28_v2 = vld [vmem:[%s590_s0 + $0x68] sm:$0xff]  ;;  %v27_v3 = vld [vmem:[%s590_s0 + $0x60] sm:$0xff]  ;;  %v431_v11 = vmov 0   ;;  %vm174_vm1 = vcmask 261120  }
   0x4   :  { %v26_v4 = vld [vmem:[%s590_s0 + $0x58] sm:$0xff]  ;;  %v25_v5 = vld [vmem:[%s590_s0 + $0x50] sm:$0xff]  ;;  %v24_v6 = vld [vmem:[%s590_s0 + $0x48] sm:$0xff]  ;;  %399 = vset.pattern.permute.xlu1 %v431_v11  ;;  %398 = vset.pattern.permute.xlu0 %v431_v11  ;;  %vm227_vm2 = vcmask 195584   ;;  %vm270_vm3 = vcmask 1043456   ;;  %vm266_vm4 = vcmask 97280  }
   0x5   :  { %v23_v7 = vld [vmem:[%s590_s0 + $0x40] sm:$0xff]  ;;  %v22_v8 = vld [vmem:[%s590_s0 + $0x38] sm:$0xff]  ;;  %v36_v9 = vld [vmem:[%s592_s2 + $0x8] sm:$0xff]  ;;  %400 = vset.pattern.permute.xlu2 %v431_v11  ;;  %vm306_vm5 = vcmask 1045504   ;;  %vm302_vm6 = vcmask 48128   ;;  %s432_s5 = smov [#allocation2]  }
   0x6   :  { %367 = vmatpush.xpose.msk.msra.mxu0 %vm59_vm0, %v29_v1  ;;  %v38_v10 = vld [vmem:[%s592_s2 + $0x18] sm:$0xff]  ;;  %v21_v12 = vld [vmem:[%s590_s0 + $0x30] sm:$0xff]  ;;  %46 = vperm.xlu1 %399, %v36_v9   ;;  %v20_v13 = vld [vmem:[%s590_s0 + $0x28] sm:$0xff]  ;;  %s357_s8 = sshll.u32 %s593_s3, 4  ;;  %s358_s8 = int_to_ptr.hbm [resolvable:$true] %s357_s8 }
   0x7   :  { %56 = vperm.xlu0 %398, %v38_v10   ;;  %v35_v14 = vld [vmem:[%s592_s2] sm:$0xff]  ;;  %v37_v15 = vld [vmem:[%s592_s2 + $0x10] sm:$0xff]  ;;  %v18_v17 = vld [vmem:[%s590_s0 + $0x18] sm:$0xff] }
   0x8   :  { %v19_v16 = vld [vmem:[%s590_s0 + $0x20] sm:$0xff]  ;;  %v17_v19 = vld [vmem:[%s590_s0 + $0x10] sm:$0xff]  ;;  %v16_v20 = vld [vmem:[%s590_s0 + $0x8] sm:$0xff] }
   0x9   :  { %v156_v18 = vld [vmem:[%s592_s2 + $0x20] sm:$0xff]  ;;  %v260_v22 = vld [vmem:[%s592_s2 + $0x48] sm:$0x3f]  ;;  %v296_v25 = vld [vmem:[%s592_s2 + $0x50] sm:$0x1] }
   0xa   :  { %368 = vmatpush.xpose.msk.msra.mxu0 %vm59_vm0, %v28_v2  ;;  %v216_v21 = vld [vmem:[%s592_s2 + $0x40] sm:$0xf]  ;;  %v32_v26 = vld [vmem:[%s591_s1 + $0x8] sm:$0xff]  ;;  %v33_v27 = vld [vmem:[%s591_s1 + $0x10] sm:$0xff] }
   0xb   :  { %v15_v23 = vld [vmem:[%s590_s0] sm:$0xff]  ;;  %v34_v28 = vld [vmem:[%s591_s1 + $0x18] sm:$0xff]  ;;  %v158_v34 = vld [vmem:[%s592_s2 + $0x30] sm:$0xff] }
   0xc   :  { %v31_v24 = vld [vmem:[%s591_s1] sm:$0xff]  ;;  %171 = vperm.xlu2 %400, %v158_v34   ;;  %v157_v40 = vld [vmem:[%s592_s2 + $0x28] sm:$0xff]  ;;  %v215_v48 = vld [vmem:[%s592_s2 + $0x38] sm:$0xff] }
   0xd   :  { %v153_v47 = vld [vmem:[%s591_s1 + $0x20] sm:$0xff]  ;;  %v154_v49 = vld [vmem:[%s591_s1 + $0x28] sm:$0xff]  ;;  %v155_v50 = vld [vmem:[%s591_s1 + $0x30] sm:$0xff] }
   0xe   :  { %369 = vmatpush.xpose.msk.msra.mxu0 %vm59_vm0, %v27_v3  ;;  %41 = vperm.xlu1 %399, %v35_v14   ;;  %v213_v63 = vld [vmem:[%s591_s1 + $0x38] sm:$0xff]  ;;  %v214_v0 = vld [vmem:[%s591_s1 + $0x40] sm:$0xf]  ;;  %v259_v9 = vld [vmem:[%s591_s1 + $0x48] sm:$0x3f] }
   0xf   :  { %51 = vperm.xlu0 %398, %v37_v15   ;;  %v295_v14 = vld [vmem:[%s591_s1 + $0x50] sm:$0x1]  ;;  %s355_s1 = sshll.u32 %s432_s5, 4  ;;  %s356_s1 = int_to_ptr.vmem [resolvable:$true] %s355_s1 }
  0x12   :  { %370 = vmatpush.xpose.msk.msra.mxu0 %vm59_vm0, %v26_v4 }
  0x14   :  { %166 = vperm.xlu2 %400, %v157_v40  }
  0x16   :  { %371 = vmatpush.xpose.msk.msra.mxu0 %vm59_vm0, %v25_v5  ;;  %224 = vperm.xlu1 %399, %v216_v21  }
  0x17   :  { %161 = vperm.xlu0 %398, %v156_v18  }
  0x1a   :  { %372 = vmatpush.xpose.msk.msra.mxu0 %vm59_vm0, %v24_v6 }
  0x1c   :  { %219 = vperm.xlu2 %400, %v215_v48  }
  0x1e   :  { %373 = vmatpush.xpose.msk.msra.mxu0 %vm59_vm0, %v23_v7  ;;  %299 = vperm.xlu1 %399, %v296_v25  }
  0x1f   :  { %263 = vperm.xlu0 %398, %v260_v22  }
  0x22   :  { %374 = vmatpush.xpose.msk.msra.mxu0 %vm59_vm0, %v22_v8 }
  0x26   :  { %375 = vmatpush.xpose.msk.msra.mxu0 %vm59_vm0, %v21_v12 }
  0x2a   :  { %376 = vmatpush.xpose.msk.msra.mxu0 %vm59_vm0, %v20_v13 }
  0x2e   :  { %377 = vmatpush.xpose.msk.msra.mxu0 %vm59_vm0, %v19_v16 }
  0x32   :  { %378 = vmatpush.xpose.msk.msra.mxu0 %vm59_vm0, %v18_v17 }
  0x36   :  { %379 = vmatpush.xpose.msk.msra.mxu0 %vm59_vm0, %v17_v19 }
  0x3a   :  { %380 = vmatpush.xpose.msk.msra.mxu0 %vm59_vm0, %v16_v20 }
  0x3e   :  { %381 = vmatpush.xpose.msk.msra.mxu0 %vm59_vm0, %v15_v23 }
  0x41   :  { %382 = vmatmul.msk.f32.vlgmr.msra.gmra.mxu0 %vm59_vm0, %v31_v24 }
  0x49   :  { %383 = vmatmul.msk.f32.gmra.mxu0 %vm59_vm0, %v32_v26 }
  0x51   :  { %384 = vmatmul.msk.f32.gmra.mxu0 %vm59_vm0, %v33_v27 }
  0x59   :  { %385 = vmatmul.msk.f32.gmra.mxu0 %vm59_vm0, %v34_v28 }
  0x66   :  { %v172_v52 = vpop.permute.xlu2 %171 }
  0x6e   :  { %v167_v54 = vpop.permute.xlu2 %166 }
  0x76   :  { %v220_v3 = vpop.permute.xlu2 %219 }
  0x78   :  { %v47_v32 = vpop.permute.xlu1 %46 }
  0x79   :  { %v57_v31 = vpop.permute.xlu0 %56 }
  0x80   :  { %v42_v39 = vpop.permute.xlu1 %41 }
  0x81   :  { %v52_v35 = vpop.permute.xlu0 %51 }
  0x88   :  { %v225_v2 = vpop.permute.xlu1 %224 }
  0x89   :  { %v162_v58 = vpop.permute.xlu0 %161 }
  0x90   :  { %v300_v15 = vpop.permute.xlu1 %299 }
  0x91   :  { %v264_v10 = vpop.permute.xlu0 %263 }
  0xbe   :  { %v137_v29 = vpop.f32.mrf.mxu0 }
  0xbf   :  { %v138_v43 = vadd.f32 %v137_v29, %v42_v39 }
  0xc1   :  { %v149_v46 = vmax.f32 %v138_v43, 0.0 }
  0xc6   :  { %v140_v30 = vpop.f32.mrf.mxu0 }
  0xc7   :  { %v141_v41 = vadd.f32 %v140_v30, %v47_v32 }
  0xc9   :  { %v150_v45 = vmax.f32 %v141_v41, 0.0 }
  0xce   :  { %v143_v33 = vpop.f32.mrf.mxu0 }
  0xcf   :  { %v144_v37 = vadd.f32 %v143_v33, %v52_v35 }
  0xd1   :  { %v151_v44 = vmax.f32 %v144_v37, 0.0 }
  0xd6   :  { %v146_v36 = vpop.f32.mrf.mxu0 }
  0xd7   :  { %v147_v38 = vadd.f32 %v146_v36, %v57_v31 }
  0xd9   :  { %v152_v42 = vmax.f32 %v147_v38, 0.0 }
  0xdb   :  { %196 = vmatpush.msra.mxu1 %v152_v42 }
  0xdd   :  { %197 = vmatpush.msra.mxu1 %v151_v44 }
  0xdf   :  { %198 = vmatpush.msra.mxu1 %v150_v45 }
  0xe1   :  { %199 = vmatpush.msra.mxu1 %v149_v46 }
  0xe2   :  { %386 = vmatmul.msk.f32.vlgmr.msra.gmra.mxu1 %vm174_vm1, %v153_v47 }
  0xea   :  { %387 = vmatmul.msk.f32.gmra.mxu1 %vm174_vm1, %v154_v49 }
  0xf2   :  { %388 = vmatmul.msk.f32.gmra.mxu1 %vm174_vm1, %v155_v50 }
 0x15f   :  { %v201_v51 = vpop.f32.mrf.mxu1 }
 0x160   :  { %v202_v59 = vadd.f32 %v201_v51, %v162_v58 }
 0x162   :  { %v210_v62 = vmax.f32 %v202_v59, 0.0 }
 0x167   :  { %v204_v53 = vpop.f32.mrf.mxu1 }
 0x168   :  { %v205_v56 = vadd.f32 %v204_v53, %v167_v54 }
 0x16a   :  { %v211_v61 = vmax.f32 %v205_v56, 0.0 }
 0x16f   :  { %v207_v55 = vpop.f32.mrf.mxu1 }
 0x170   :  { %v208_v57 = vadd.f32 %v207_v55, %v172_v52 }
 0x172   :  { %v212_v60 = vmax.f32 %v208_v57, 0.0 }
 0x174   :  { %247 = vmatpush.msra.mxu2 %v212_v60 }
 0x176   :  { %248 = vmatpush.msra.mxu2 %v211_v61 }
 0x178   :  { %249 = vmatpush.msra.mxu2 %v210_v62 }
 0x179   :  { %389 = vmatmul.msk.f32.vlgmr.msra.gmra.mxu2 %vm227_vm2, %v213_v63 }
 0x181   :  { %390 = vmatmul.msk.f32.gmra.mxu2 %vm227_vm2, %v214_v0 }
 0x1fc   :  { %v251_v1 = vpop.f32.mrf.mxu2 }
 0x1fd   :  { %v252_v5 = vadd.f32 %v251_v1, %v220_v3 }
 0x1ff   :  { %v257_v8 = vmax.f32 %v252_v5, 0.0 }
 0x204   :  { %v254_v4 = vpop.f32.mrf.mxu2 }
 0x205   :  { %v255_v6 = vadd.f32 %v254_v4, %v225_v2 }
 0x207   :  { %v258_v7 = vmax.f32 %v255_v6, 0.0 }
 0x209   :  { %391 = vmatpush.msk.msra.mxu3 %vm270_vm3, %v258_v7 }
 0x20b   :  { %289 = vmatpush.msra.mxu3 %v257_v8 }
 0x20c   :  { %392 = vmatmul.msk.f32.vlgmr.msra.gmra.mxu3 %vm266_vm4, %v259_v9 }
 0x28f   :  { %v291_v11 = vpop.f32.mrf.mxu3 }
 0x290   :  { %v292_v12 = vadd.f32 %v291_v11, %v264_v10 }
 0x292   :  { %v294_v13 = vmax.f32 %v292_v12, 0.0 }
 0x294   :  { %393 = vmatpush.msk.msrb.mxu3 %vm306_vm5, %v294_v13 }
 0x295   :  { %394 = vmatmul.msk.f32.vlgmr.msrb.gmra.mxu3 %vm302_vm6, %v295_v14 }
 0x318   :  { %v327_v16 = vpop.f32.mrf.mxu3 }
 0x319   :  { %v328_v17 = vadd.f32 %v327_v16, %v300_v15 }
 0x31b   :  { %v395_v18 = vmul.f32 -1.442695, %v328_v17 }
 0x31d   :  { %401 = vpow2.f32 %v395_v18 }
 0x323   :  { %v402_v19 = vpop.eup %401 }
 0x324   :  { %v333_v20 = vadd.f32 1.0, %v402_v19 }
 0x326   :  { %403 = vrcp.f32 %v333_v20  ;;  %v345_v24 = vand.u32 2147483648, %v333_v20  ;;  %v343_v26 = vand.u32 2147483647, %v333_v20  ;;  %vm339_vm8 = vweird.f32 %v333_v20 }
 0x328   :  { %v346_v28 = vor.u32 1.1754944e-38, %v345_v24  ;;  %vm344_vm10 = vcmp.eq.f32.partialorder %v343_v26, 8.507059e+37 }
 0x32c   :  { %v404_v21 = vpop.eup %403 }
 0x32d   :  { %v335_v22 = vmul.f32 %v404_v21, %v333_v20  ;;  %vm340_vm7 = vweird.f32 %v404_v21 }
 0x32e   :  { %vm341_vm9 = vmor %vm339_vm8, %vm340_vm7 }
 0x32f   :  { %v336_v23 = vsub.f32 1.0, %v335_v22 }
 0x331   :  { %v337_v25 = vmul.f32 %v404_v21, %v336_v23 }
 0x333   :  { %v338_v27 = vadd.f32 %v404_v21, %v337_v25 }
 0x335   :  { %v342_v29 = vsel %vm341_vm9, %v404_v21, %v338_v27 }
 0x336   :  { %v347_v30 = vsel %vm344_vm10, %v346_v28, %v342_v29 }
 0x337   :  { %349 = vst [vmem:[#allocation2] sm:$0x1] %v347_v30 }
 0x338   :  { %360 = dma.vmem_to_hbm [thread:$0]  %s356_s1, 16, %s358_s8, [#allocation3]  }
 0x339   :  { %429 = dma.done.wait [#allocation3], 16  }
 0x33a   :  { %430 = vsyncadd [#allocation3], 4294967280 }
 0x33b   :  { %365 = vsyncpa [#allocation3], 1 }

</bundles_post_ra>
